<compile_context>
chip_gen: v5e
topology: v5e:2x2
jax: 0.10.0
libtpu: 0.0.40
codegen_flags: <defaults>
</compile_context>

<pallas_src>
import functools

import jax
import jax.numpy as jnp
from jax.experimental import pallas as pl
from jax.experimental.pallas import tpu as pltpu

_INV_SQRT2 = 0.7071067811865476
_SQRT_2_OVER_PI = 0.7978845608028654


def _round_up(x, m):
    return ((x + m - 1) // m) * m


def _cdiv(a, b):
    return (a + b - 1) // b


def _gelu_exact(x):
    # PyTorch nn.GELU default: exact erf-based GELU.
    return 0.5 * x * (1.0 + jax.lax.erf(x * jnp.asarray(_INV_SQRT2, x.dtype)))


def _gelu_tanh(x):
    # tanh approximation (routes through the EUP); only used with approx_gelu=True.
    c = jnp.asarray(_SQRT_2_OVER_PI, x.dtype)
    return 0.5 * x * (1.0 + jnp.tanh(c * (x + 0.044715 * x * x * x)))


def mlp_kernel(x_ref, w1_ref, b1_ref, w2_ref, b2_ref, o_ref, *scratch,
               approx_gelu):
    # If no scratch is passed the (f32) output block itself is the accumulator.
    acc_ref = scratch[0] if scratch else o_ref
    j = pl.program_id(1)

    @pl.when(j == 0)
    def _():
        acc_ref[...] = jnp.zeros_like(acc_ref)

    # First linear (this intermediate tile) + bias + GELU; f32 MXU accumulation.
    # NOTE: operands are in the compute dtype (bf16 by default); for strict f32
    # parity call mlp_forward(..., compute_dtype=jnp.float32).
    h = jnp.dot(x_ref[...], w1_ref[...], preferred_element_type=jnp.float32)
    h = h + b1_ref[...]                              # b1 stored as f32
    h = _gelu_tanh(h) if approx_gelu else _gelu_exact(h)

    # Second linear: partial contraction over this intermediate tile.
    acc_ref[...] += jnp.dot(h.astype(w2_ref.dtype), w2_ref[...],
                            preferred_element_type=jnp.float32)

    @pl.when(j == pl.num_programs(1) - 1)
    def _():
        # TODO(synk): dropout is 0.0 (identity); nonzero dropout would use
        # pltpu.prng_seed / pltpu.prng_random_bits to build a keep-mask here.
        o_ref[...] = (acc_ref[...] + b2_ref[...]).astype(o_ref.dtype)


@functools.lru_cache(maxsize=None)
def _vmem_capacity_bytes():
    try:
        cap = int(pltpu.get_tpu_info().vmem_capacity_bytes)
        if cap > 0:
            return cap
    except Exception:
        pass
    return 64 * 1024 * 1024  # conservative fallback (v7x-sized VMEM)


def _select_tiles(t_aligned, h_pad, i_pad, cbytes, obytes, sublane,
                  block_tokens, budget, use_out_acc):
    """Pick (bt, bi) so the double-buffered footprint fits the VMEM budget."""

    def footprint(bt, bi):
        fp = 2 * bt * h_pad * cbytes                    # x tile
        fp += 2 * h_pad * bi * cbytes                   # W1 tile
        fp += 2 * bi * h_pad * cbytes                   # W2 tile
        fp += 2 * 8 * bi * 4 + 2 * 8 * h_pad * 4        # biases (sublane-padded)
        fp += 2 * bt * h_pad * obytes                   # out tile
        if not use_out_acc:
            fp += bt * h_pad * 4                        # f32 accumulator scratch
        fp += 2 * bt * bi * 4                           # live intermediate h
        return fp

    # Token-tile candidates: requested size, halved down to one sublane row.
    bt_req = min(_round_up(block_tokens, sublane), t_aligned)
    bt_cands = []
    bt = bt_req
    while bt >= sublane:
        bt_a = _round_up(bt, sublane)
        if bt_a not in bt_cands:
            bt_cands.append(bt_a)
        bt //= 2
    if sublane not in bt_cands:
        bt_cands.append(sublane)

    # Intermediate-tile candidates: multiples of 128 that divide i_pad.
    k = i_pad // 128
    bi_cands = [128 * m for m in range(k, 0, -1) if k % m == 0]

    # 1) Prefer fully resident weights (bi == i_pad -> weights DMA'd once).
    bt_min_resident = min(128, t_aligned)
    for bt in bt_cands:
        if bt >= bt_min_resident and footprint(bt, i_pad) <= budget:
            return bt, i_pad
    # 2) Stream weights along the reduction axis; keep bt as large as possible
    #    to amortize the per-token-tile weight restream.
    for bt in bt_cands:
        for bi in bi_cands:
            if footprint(bt, bi) <= budget:
                return bt, bi
    # 3) Fallback: smallest tiles.
    # TODO(synk): for very large H on small-VMEM chips, tile the hidden dim
    # with an extra grid axis over W2/out/b2 instead of full-width h_pad.
    return bt_cands[-1], bi_cands[-1]


def prepare_mlp_params(w1, b1, w2, b2, *, compute_dtype=jnp.bfloat16):
    """Pad weights to lane multiples and cast once, outside the hot path."""
    hidden, inter = w1.shape
    h_pad = _round_up(max(hidden, 128), 128)
    i_pad = _round_up(max(inter, 128), 128)
    cdt = jnp.dtype(compute_dtype)
    w1p = jnp.pad(w1.astype(cdt), ((0, h_pad - hidden), (0, i_pad - inter)))
    w2p = jnp.pad(w2.astype(cdt), ((0, i_pad - inter), (0, h_pad - hidden)))
    b1p = jnp.pad(b1.astype(jnp.float32), (0, i_pad - inter)).reshape(1, i_pad)
    b2p = jnp.pad(b2.astype(jnp.float32), (0, h_pad - hidden)).reshape(1, h_pad)
    return w1p, b1p, w2p, b2p


@functools.partial(jax.jit,
                   static_argnames=("block_tokens", "compute_dtype",
                                    "approx_gelu"))
def mlp_forward(x, w1, b1, w2, b2, *, block_tokens=512,
                compute_dtype=jnp.bfloat16, approx_gelu=False):
    """x: [..., H]; returns same shape.  Accepts raw or prepare_mlp_params()
    parameters (pads below become no-ops for prepared ones)."""
    orig_shape = x.shape
    out_dtype = x.dtype
    hidden = orig_shape[-1]

    x2d = x.reshape(-1, hidden)                      # [T, H]
    t = x2d.shape[0]

    cdt = jnp.dtype(x.dtype if compute_dtype is None else compute_dtype)
    cbytes = cdt.itemsize
    obytes = jnp.dtype(out_dtype).itemsize
    sublane = 8 if cbytes >= 4 else (16 if cbytes == 2 else 32)

    h_pad = _round_up(max(hidden, 128), 128)
    i_pad = _round_up(max(w1.shape[1], 128), 128)

    # f32 output -> accumulate directly into the resident output block.
    use_out_acc = jnp.dtype(out_dtype) == jnp.dtype(jnp.float32)

    # Generation-aware VMEM budget (leave headroom for internal scratch).
    cap = _vmem_capacity_bytes()
    budget = max(min(int(cap * 0.82), cap - 8 * 1024 * 1024), 16 * 1024 * 1024)

    t_aligned = _round_up(max(t, sublane), sublane)
    bt, bi = _select_tiles(t_aligned, h_pad, i_pad, cbytes, obytes, sublane,
                           block_tokens, budget, use_out_acc)

    # With resident weights, prefer >=2 token tiles so v7x's two TensorCores
    # both get work on short sequences (negligible cost elsewhere; skipped for
    # streamed weights since it would double weight HBM traffic on 1-TC chips).
    if bi == i_pad and _cdiv(t_aligned, bt) < 2 and t_aligned >= 2 * sublane:
        bt = _round_up(_cdiv(t_aligned, 2), sublane)

    t_pad = _round_up(t, bt)

    # Zero padding is mathematically exact for this MLP: padded x rows / W1
    # cols contribute 0, gelu(0)=0 kills padded intermediate columns, padded
    # W2/b2 columns stay 0 and are sliced off below.
    xp = jnp.pad(x2d.astype(cdt), ((0, t_pad - t), (0, h_pad - hidden)))
    w1p = jnp.pad(w1.astype(cdt),
                  ((0, h_pad - w1.shape[0]), (0, i_pad - w1.shape[1])))
    w2p = jnp.pad(w2.astype(cdt),
                  ((0, i_pad - w2.shape[0]), (0, h_pad - w2.shape[1])))
    b1_2d = b1.reshape(1, -1)
    b2_2d = b2.reshape(1, -1)
    b1p = jnp.pad(b1_2d.astype(jnp.float32),
                  ((0, 0), (0, i_pad - b1_2d.shape[1])))
    b2p = jnp.pad(b2_2d.astype(jnp.float32),
                  ((0, 0), (0, h_pad - b2_2d.shape[1])))

    grid = (t_pad // bt, i_pad // bi)
    scratch_shapes = [] if use_out_acc else [pltpu.VMEM((bt, h_pad), jnp.float32)]

    inter = w1.shape[1]
    cost = pl.CostEstimate(
        flops=4 * t * hidden * inter,                # two matmuls
        transcendentals=t * inter,                   # erf / tanh
        bytes_accessed=(x2d.size * cbytes + w1.size * cbytes
                        + w2.size * cbytes + b1.size * 4 + b2.size * 4
                        + t * hidden * obytes),
    )

    # TODO(synk): if weight DMA is still exposed at very large H*I, bump the
    # W1/W2 specs to pipeline_mode=pl.Buffered(3).
    out = pl.pallas_call(
        functools.partial(mlp_kernel, approx_gelu=approx_gelu),
        out_shape=jax.ShapeDtypeStruct((t_pad, h_pad), out_dtype),
        grid_spec=pltpu.PrefetchScalarGridSpec(
            num_scalar_prefetch=0,
            grid=grid,
            in_specs=[
                pl.BlockSpec((bt, h_pad), lambda i, j: (i, 0)),   # x tile
                pl.BlockSpec((h_pad, bi), lambda i, j: (0, j)),   # W1 tile
                pl.BlockSpec((1, bi), lambda i, j: (0, j)),       # b1 tile
                pl.BlockSpec((bi, h_pad), lambda i, j: (j, 0)),   # W2 tile
                pl.BlockSpec((1, h_pad), lambda i, j: (0, 0)),    # b2
            ],
            out_specs=pl.BlockSpec((bt, h_pad), lambda i, j: (i, 0)),
            scratch_shapes=scratch_shapes,
        ),
        compiler_params=pltpu.CompilerParams(
            dimension_semantics=("parallel", "arbitrary"),
            vmem_limit_bytes=int(budget),
        ),
        cost_estimate=cost,
    )(xp, w1p, b1p, w2p, b2p)

    return out[:t, :hidden].reshape(orig_shape)


def init_mlp_params(key, hidden_dim, intermediate_dim, dtype=jnp.float32):
    """Deterministic init mirroring nn.Linear's U(-1/sqrt(fan_in), 1/sqrt(fan_in))."""
    k1, k2, k3, k4 = jax.random.split(key, 4)
    lim1 = 1.0 / jnp.sqrt(hidden_dim)
    lim2 = 1.0 / jnp.sqrt(intermediate_dim)
    w1 = jax.random.uniform(k1, (hidden_dim, intermediate_dim), dtype,
                            minval=-lim1, maxval=lim1)
    b1 = jax.random.uniform(k2, (intermediate_dim,), dtype,
                            minval=-lim1, maxval=lim1)
    w2 = jax.random.uniform(k3, (intermediate_dim, hidden_dim), dtype,
                            minval=-lim2, maxval=lim2)
    b2 = jax.random.uniform(k4, (hidden_dim,), dtype,
                            minval=-lim2, maxval=lim2)
    return w1, b1, w2, b2


if __name__ == "__main__":
    batch, seq, hidden_dim = 2, 8, 32
    intermediate_dim = 4 * hidden_dim  # 128

    key = jax.random.PRNGKey(0)
    kx, kp = jax.random.split(key)
    x = jax.random.normal(kx, (batch, seq, hidden_dim), jnp.float32)
    w1, b1, w2, b2 = init_mlp_params(kp, hidden_dim, intermediate_dim)

    # Pure-JAX reference (exact erf GELU, f32).
    ref = jnp.dot(x.reshape(-1, hidden_dim), w1) + b1
    ref = 0.5 * ref * (1.0 + jax.lax.erf(ref / jnp.sqrt(2.0)))
    ref = (jnp.dot(ref, w2) + b2).reshape(batch, seq, hidden_dim)

    # Default path: bf16 MXU compute, f32 accumulation, weights prepared once
    # (pad + cast hoisted out of the hot path).
    w1p, b1p, w2p, b2p = prepare_mlp_params(w1, b1, w2, b2)
    out = jax.block_until_ready(mlp_forward(x, w1p, b1p, w2p, b2p))
    assert out.shape == (batch, seq, hidden_dim)
    assert out.dtype == x.dtype
    assert jnp.allclose(out, ref, atol=5e-2, rtol=5e-2)

    # Explicit f32 compute path (raw params, tight check vs the f32 reference).
    out_f32 = jax.block_until_ready(
        mlp_forward(x, w1, b1, w2, b2, compute_dtype=jnp.float32))
    assert jnp.allclose(out_f32, ref, atol=1e-5, rtol=1e-5)

    # bf16 output path (exercises the f32 accumulator scratch variant).
    out_bf16 = jax.block_until_ready(
        mlp_forward(x.astype(jnp.bfloat16), w1p, b1p, w2p, b2p))
    assert out_bf16.dtype == jnp.bfloat16
    assert jnp.allclose(out_bf16.astype(jnp.float32), ref, atol=5e-2, rtol=5e-2)

    print("KERNEL_OK")
</pallas_src>

<mosaic_0001>
module attributes {stable_mosaic.version = 11 : i64} {
  func.func @mlp_kernel(%arg0: i32, %arg1: i32, %arg2: memref<16x128xbf16, #tpu.memory_space<vmem>>, %arg3: memref<128x128xbf16, #tpu.memory_space<vmem>>, %arg4: memref<1x128xf32, #tpu.memory_space<vmem>>, %arg5: memref<128x128xbf16, #tpu.memory_space<vmem>>, %arg6: memref<1x128xf32, #tpu.memory_space<vmem>>, %arg7: memref<16x128xf32, #tpu.memory_space<vmem>>) attributes {dimension_semantics = [#tpu.dimension_semantics<parallel>, #tpu.dimension_semantics<arbitrary>], iteration_bounds = array<i64: 1, 1>, scalar_prefetch = 0 : i64, scratch_operands = 0 : i64, tpu.core_type = #tpu.core_type<tc>, window_params = [{transform_indices = @transform_0, window_bounds = array<i64: 16, 128>}, {transform_indices = @transform_1, window_bounds = array<i64: 128, 128>}, {transform_indices = @transform_2, window_bounds = array<i64: 1, 128>}, {transform_indices = @transform_3, window_bounds = array<i64: 128, 128>}, {pipeline_mode = #tpu.pipeline_mode<synchronous>, transform_indices = @transform_4, window_bounds = array<i64: 1, 128>}, {transform_indices = @transform_5, window_bounds = array<i64: 16, 128>}]} {
    %c0_i32 = arith.constant 0 : i32
    %0 = arith.cmpi eq, %arg1, %c0_i32 : i32
    %1 = arith.extui %0 : i1 to i32
    %c0_i32_0 = arith.constant 0 : i32
    %2 = arith.cmpi ne, %1, %c0_i32_0 : i32
    scf.if %2 {
      %cst_18 = arith.constant 0.000000e+00 : f32
      %26 = vector.broadcast %cst_18 : f32 to vector<16x128xf32>
      %c0_19 = arith.constant 0 : index
      %c0_20 = arith.constant 0 : index
      %27 = vector.load %arg7[%c0_19, %c0_20] : memref<16x128xf32, #tpu.memory_space<vmem>>, vector<16x128xf32>
      tpu.vector_store %arg7[%c0_19, %c0_20], %26 {strides = array<i32>} : memref<16x128xf32, #tpu.memory_space<vmem>>, vector<16x128xf32>,
    } else {
    }
    %c0 = arith.constant 0 : index
    %c0_1 = arith.constant 0 : index
    %3 = vector.load %arg2[%c0, %c0_1] : memref<16x128xbf16, #tpu.memory_space<vmem>>, vector<16x128xbf16>
    %c0_2 = arith.constant 0 : index
    %c0_3 = arith.constant 0 : index
    %4 = vector.load %arg3[%c0_2, %c0_3] : memref<128x128xbf16, #tpu.memory_space<vmem>>, vector<128x128xbf16>
    %cst = arith.constant dense<0.000000e+00> : vector<16x128xf32>
    %5 = tpu.matmul %3, %4, %cst {dimension_numbers = #tpu.dot_dimension_numbers<[1], [0], [0], [1], [0, 0, 1, 1], [], []>} : vector<16x128xbf16>, vector<128x128xbf16>, vector<16x128xf32> -> vector<16x128xf32>
    %c0_4 = arith.constant 0 : index
    %c0_5 = arith.constant 0 : index
    %6 = vector.load %arg4[%c0_4, %c0_5] : memref<1x128xf32, #tpu.memory_space<vmem>>, vector<1x128xf32>
    %7 = vector.broadcast %6 : vector<1x128xf32> to vector<16x128xf32>
    %8 = arith.addf %5, %7 : vector<16x128xf32>
    %cst_6 = arith.constant 5.000000e-01 : f32
    %9 = vector.broadcast %cst_6 : f32 to vector<16x128xf32>
    %10 = arith.mulf %9, %8 : vector<16x128xf32>
    %cst_7 = arith.constant 0.707106769 : f32
    %11 = vector.broadcast %cst_7 : f32 to vector<16x128xf32>
    %12 = arith.mulf %8, %11 : vector<16x128xf32>
    %13 = math.erf %12 : vector<16x128xf32>
    %cst_8 = arith.constant 1.000000e+00 : f32
    %14 = vector.broadcast %cst_8 : f32 to vector<16x128xf32>
    %15 = arith.addf %14, %13 : vector<16x128xf32>
    %16 = arith.mulf %10, %15 : vector<16x128xf32>
    %c0_9 = arith.constant 0 : index
    %c0_10 = arith.constant 0 : index
    %17 = vector.load %arg7[%c0_9, %c0_10] : memref<16x128xf32, #tpu.memory_space<vmem>>, vector<16x128xf32>
    %18 = arith.truncf %16 : vector<16x128xf32> to vector<16x128xbf16>
    %c0_11 = arith.constant 0 : index
    %c0_12 = arith.constant 0 : index
    %19 = vector.load %arg5[%c0_11, %c0_12] : memref<128x128xbf16, #tpu.memory_space<vmem>>, vector<128x128xbf16>
    %cst_13 = arith.constant dense<0.000000e+00> : vector<16x128xf32>
    %20 = tpu.matmul %18, %19, %cst_13 {dimension_numbers = #tpu.dot_dimension_numbers<[1], [0], [0], [1], [0, 0, 1, 1], [], []>} : vector<16x128xbf16>, vector<128x128xbf16>, vector<16x128xf32> -> vector<16x128xf32>
    %21 = arith.addf %17, %20 : vector<16x128xf32>
    %c0_14 = arith.constant 0 : index
    %c0_15 = arith.constant 0 : index
    %22 = vector.load %arg7[%c0_14, %c0_15] : memref<16x128xf32, #tpu.memory_space<vmem>>, vector<16x128xf32>
    tpu.vector_store %arg7[%c0_14, %c0_15], %21 {strides = array<i32>} : memref<16x128xf32, #tpu.memory_space<vmem>>, vector<16x128xf32>,
    %c0_i32_16 = arith.constant 0 : i32
    %23 = arith.cmpi eq, %arg1, %c0_i32_16 : i32
    %24 = arith.extui %23 : i1 to i32
    %c0_i32_17 = arith.constant 0 : i32
    %25 = arith.cmpi ne, %24, %c0_i32_17 : i32
    scf.if %25 {
      %c0_18 = arith.constant 0 : index
      %c0_19 = arith.constant 0 : index
      %26 = vector.load %arg7[%c0_18, %c0_19] : memref<16x128xf32, #tpu.memory_space<vmem>>, vector<16x128xf32>
      %c0_20 = arith.constant 0 : index
      %c0_21 = arith.constant 0 : index
      %27 = vector.load %arg6[%c0_20, %c0_21] : memref<1x128xf32, #tpu.memory_space<vmem>>, vector<1x128xf32>
      %28 = vector.broadcast %27 : vector<1x128xf32> to vector<16x128xf32>
      %29 = arith.addf %26, %28 : vector<16x128xf32>
      %c0_22 = arith.constant 0 : index
      %c0_23 = arith.constant 0 : index
      %30 = vector.load %arg7[%c0_22, %c0_23] : memref<16x128xf32, #tpu.memory_space<vmem>>, vector<16x128xf32>
      tpu.vector_store %arg7[%c0_22, %c0_23], %29 {strides = array<i32>} : memref<16x128xf32, #tpu.memory_space<vmem>>, vector<16x128xf32>,
    } else {
    }
    return
  }
  func.func @transform_0(%arg0: i32, %arg1: i32) -> (i32, i32) {
    %c0_i32 = arith.constant 0 : i32
    %c0_i32_0 = arith.constant 0 : i32
    return %arg0, %c0_i32 : i32, i32
  }
  func.func @transform_1(%arg0: i32, %arg1: i32) -> (i32, i32) {
    %c0_i32 = arith.constant 0 : i32
    %c0_i32_0 = arith.constant 0 : i32
    return %c0_i32, %arg1 : i32, i32
  }
  func.func @transform_2(%arg0: i32, %arg1: i32) -> (i32, i32) {
    %c0_i32 = arith.constant 0 : i32
    %c0_i32_0 = arith.constant 0 : i32
    return %c0_i32, %arg1 : i32, i32
  }
  func.func @transform_3(%arg0: i32, %arg1: i32) -> (i32, i32) {
    %c0_i32 = arith.constant 0 : i32
    %c0_i32_0 = arith.constant 0 : i32
    return %arg1, %c0_i32 : i32, i32
  }
  func.func @transform_4(%arg0: i32, %arg1: i32) -> (i32, i32) {
    %c0_i32 = arith.constant 0 : i32
    %c0_i32_0 = arith.constant 0 : i32
    %c0_i32_1 = arith.constant 0 : i32
    return %c0_i32, %c0_i32_0 : i32, i32
  }
  func.func @transform_5(%arg0: i32, %arg1: i32) -> (i32, i32) {
    %c0_i32 = arith.constant 0 : i32
    %c0_i32_0 = arith.constant 0 : i32
    return %arg0, %c0_i32 : i32, i32
  }
}

</mosaic_0001>

<bundles_post_ra>
// kernel: mlp_forward.1
= control target key start
LH: loop header
LB: loop body
LE: loop exit
PB: predicated region body
PF: predicated region fallthrough
CT: control target
= control target key end

     0   :  { %10 = vsyncpa [#allocation3], 0  ;;  %s563_s0 = inlined_call_operand.vmem [shape: bf16[16,128], index: 0, kind: input, shape index: {}]   ;;  %s564_s1 = inlined_call_operand.hbm [shape: bf16[128,128], index: 1, kind: input, shape index: {}]   ;;  %s565_s2 = inlined_call_operand.vmem [shape: f32[1,128], index: 2, kind: input, shape index: {}]   ;;  %s566_s3 = inlined_call_operand.hbm [shape: bf16[128,128], index: 3, kind: input, shape index: {}]   ;;  %s567_s4 = inlined_call_operand.vmem [shape: f32[1,128], index: 4, kind: input, shape index: {}]   ;;  %s568_s5 = inlined_call_operand.vmem [shape: f32[16,128], index: 5, kind: output, shape index: {}]  }
   0x1   :  { %s18_s20 = sshll.u32 %s564_s1, 4  ;;  %s19_s20 = int_to_ptr.hbm [resolvable:$true] %s18_s20 }
   0x2   :  { %11 = vsyncpa [#allocation5], 0  ;;  %s490_s21 = smov [#allocation2]   ;;  %s33_s25 = sshll.u32 %s566_s3, 4  ;;  %s34_s25 = int_to_ptr.hbm [resolvable:$true] %s33_s25 }
   0x3   :  { %s20_s22 = sshll.u32 %s490_s21, 4  ;;  %s491_s26 = smov 64   ;;  %s21_s22 = int_to_ptr.vmem [resolvable:$true] %s20_s22 }
   0x4   :  { %s492_s27 = smov 4   ;;  %s493_s28 = smov [#allocation4]  }
   0x5   :  { %26 = dma.hbm_to_vmem [thread:$0]  %s19_s20, 1024, %s21_s22, [#allocation3], %s491_s26, %s491_s26, %s492_s27  }
   0x6   :  { %s35_s29 = sshll.u32 %s493_s28, 4  ;;  %s36_s29 = int_to_ptr.vmem [resolvable:$true] %s35_s29 }
   0x7   :  { %41 = dma.hbm_to_vmem [thread:$0]  %s34_s25, 1024, %s36_s29, [#allocation5], %s491_s26, %s491_s26, %s492_s27  }
   0x8   :  { %486 = dma.done.wait [#allocation3], 1024  }
   0x9   :  { %487 = vsyncadd [#allocation3], 4294966272 }
   0xa   :  { %488 = dma.done.wait [#allocation5], 1024  }
   0xb   :  { %489 = vsyncadd [#allocation5], 4294966272  ;;  %v418_v0 = vld [vmem:[#allocation2 + $0x38] sm:$0xff]  ;;  %v417_v1 = vld [vmem:[#allocation2 + $0x30] sm:$0xff] }
   0xc   :  { %134 = vmatpush.bf16.msra.mxu0 %v418_v0  ;;  %v416_v2 = vld [vmem:[#allocation2 + $0x28] sm:$0xff]  ;;  %v415_v3 = vld [vmem:[#allocation2 + $0x20] sm:$0xff]  ;;  %v414_v4 = vld [vmem:[#allocation2 + $0x18] sm:$0xff] }
   0xd   :  { %v413_v5 = vld [vmem:[#allocation2 + $0x10] sm:$0xff]  ;;  %v412_v6 = vld [vmem:[#allocation2 + $0x8] sm:$0xff]  ;;  %v411_v7 = vld [vmem:[#allocation2] sm:$0xff] }
   0xe   :  { %v410_v8 = vld [vmem:[%s563_s0] sm:$0xff]  ;;  %v426_v10 = vld [vmem:[#allocation4 + $0x38] sm:$0xff]  ;;  %v425_v14 = vld [vmem:[#allocation4 + $0x30] sm:$0xff] }
   0xf   :  { %v432_v9 = vld [vmem:[%s565_s2] ss:$0 sm:$0xff]  ;;  %303 = vmatpush.bf16.msra.mxu1 %v426_v10  ;;  %v424_v16 = vld [vmem:[#allocation4 + $0x28] sm:$0xff]  ;;  %v422_v27 = vld [vmem:[#allocation4 + $0x18] sm:$0xff] }
  0x10   :  { %135 = vmatpush.bf16.msra.mxu0 %v417_v1  ;;  %v423_v21 = vld [vmem:[#allocation4 + $0x20] sm:$0xff]  ;;  %v421_v33 = vld [vmem:[#allocation4 + $0x10] sm:$0xff]  ;;  %v420_v41 = vld [vmem:[#allocation4 + $0x8] sm:$0xff] }
  0x11   :  { %v419_v48 = vld [vmem:[#allocation4] sm:$0xff] }
  0x13   :  { %304 = vmatpush.bf16.msra.mxu1 %v425_v14 }
  0x14   :  { %136 = vmatpush.bf16.msra.mxu0 %v416_v2 }
  0x17   :  { %305 = vmatpush.bf16.msra.mxu1 %v424_v16 }
  0x18   :  { %137 = vmatpush.bf16.msra.mxu0 %v415_v3 }
  0x1b   :  { %306 = vmatpush.bf16.msra.mxu1 %v423_v21 }
  0x1c   :  { %138 = vmatpush.bf16.msra.mxu0 %v414_v4 }
  0x1f   :  { %307 = vmatpush.bf16.msra.mxu1 %v422_v27 }
  0x20   :  { %139 = vmatpush.bf16.msra.mxu0 %v413_v5 }
  0x23   :  { %308 = vmatpush.bf16.msra.mxu1 %v421_v33 }
  0x24   :  { %140 = vmatpush.bf16.msra.mxu0 %v412_v6 }
  0x27   :  { %309 = vmatpush.bf16.msra.mxu1 %v420_v41 }
  0x28   :  { %141 = vmatpush.bf16.msra.mxu0 %v411_v7 }
  0x2b   :  { %142 = vmatmul.bf16.vlgmr.msra.gmra.mxu0 %v410_v8  ;;  %310 = vmatpush.bf16.msra.mxu1 %v419_v48 }
  0xa8   :  { %v143_v11 = vpop.f32.mrf.mxu0 }
  0xa9   :  { %v536_v12 = vadd.f32 %v432_v9, %v143_v11 }
  0xab   :  { %v539_v13 = vmul.f32 0.70710677, %v536_v12 }
  0xad   :  { %v152_v15 = vmul.f32 %v539_v13, %v539_v13 }
  0xaf   :  { %v153_v17 = vmin.f32 %v152_v15, 16.0 }
  0xb0   :  { %v145_v18 = vpop.f32.mrf.mxu0 }
  0xb1   :  { %v154_v19 = vmul.f32 2.1237322e-06, %v153_v17  ;;  %v543_v20 = vadd.f32 %v432_v9, %v145_v18  ;;  %v165_v22 = vmul.f32 3.8918573e-05, %v153_v17 }
  0xb3   :  { %v155_v23 = vadd.f32 0.00028619796, %v154_v19  ;;  %v546_v24 = vmul.f32 0.70710677, %v543_v20  ;;  %v166_v25 = vadd.f32 0.001143296, %v165_v22 }
  0xb5   :  { %v192_v26 = vmul.f32 %v546_v24, %v546_v24  ;;  %v156_v28 = vmul.f32 %v155_v23, %v153_v17  ;;  %v167_v29 = vmul.f32 %v166_v25, %v153_v17 }
  0xb7   :  { %v193_v30 = vmin.f32 %v192_v26, 16.0  ;;  %v168_v31 = vadd.f32 0.014752088, %v167_v29  ;;  %v157_v35 = vadd.f32 0.0036580483, %v156_v28 }
  0xb9   :  { %v194_v32 = vmul.f32 2.1237322e-06, %v193_v30  ;;  %v205_v34 = vmul.f32 3.8918573e-05, %v193_v30  ;;  %v169_v36 = vmul.f32 %v168_v31, %v153_v17  ;;  %v158_v43 = vmul.f32 %v157_v35, %v153_v17 }
  0xba   :  { %v149_v35 = vmul.f32 0.5, %v543_v20 }
  0xbb   :  { %v195_v37 = vadd.f32 0.00028619796, %v194_v32  ;;  %v206_v38 = vadd.f32 0.001143296, %v205_v34  ;;  %v170_v39 = vadd.f32 0.112945676, %v169_v36 }
  0xbc   :  { %v159_v50 = vadd.f32 0.05243302, %v158_v43  ;;  %v148_v34 = vmul.f32 0.5, %v536_v12 }
  0xbd   :  { %v196_v40 = vmul.f32 %v195_v37, %v193_v30  ;;  %v207_v42 = vmul.f32 %v206_v38, %v193_v30  ;;  %v171_v44 = vmul.f32 %v170_v39, %v153_v17 }
  0xbe   :  { %v160_v56 = vmul.f32 %v159_v50, %v153_v17 }
  0xbf   :  { %v197_v45 = vadd.f32 0.0036580483, %v196_v40  ;;  %v208_v46 = vadd.f32 0.014752088, %v207_v42  ;;  %v172_v47 = vadd.f32 0.4994258, %v171_v44 }
  0xc0   :  { %v161_v60 = vadd.f32 0.18741608, %v160_v56 }
  0xc1   :  { %v209_v49 = vmul.f32 %v208_v46, %v193_v30  ;;  %v173_v51 = vmul.f32 %v172_v47, %v153_v17  ;;  %v198_v52 = vmul.f32 %v197_v45, %v193_v30 }
  0xc2   :  { %v162_v1 = vmul.f32 %v161_v60, %v153_v17 }
  0xc3   :  { %v210_v53 = vadd.f32 0.112945676, %v209_v49  ;;  %v174_v54 = vadd.f32 1.0, %v173_v51  ;;  %v199_v57 = vadd.f32 0.05243302, %v198_v52 }
  0xc4   :  { %v163_v7 = vadd.f32 1.1283791, %v162_v1 }
  0xc5   :  { %v211_v55 = vmul.f32 %v210_v53, %v193_v30  ;;  %434 = vrcp.f32 %v174_v54  ;;  %v200_v61 = vmul.f32 %v199_v57, %v193_v30  ;;  %v186_v4 = vand.u32 2147483648, %v174_v54 }
  0xc6   :  { %v184_v6 = vand.u32 2147483647, %v174_v54  ;;  %vm180_vm1 = vweird.f32 %v174_v54  ;;  %v164_v16 = vmul.f32 %v163_v7, %v539_v13 }
  0xc7   :  { %v212_v58 = vadd.f32 0.4994258, %v211_v55  ;;  %v201_v2 = vadd.f32 0.18741608, %v200_v61  ;;  %v187_v11 = vor.u32 1.1754944e-38, %v186_v4 }
  0xc8   :  { %vm185_vm3 = vcmp.eq.f32.partialorder %v184_v6, 8.507059e+37 }
  0xc9   :  { %v213_v59 = vmul.f32 %v212_v58, %v193_v30  ;;  %v202_v9 = vmul.f32 %v201_v2, %v193_v30 }
  0xcb   :  { %v214_v62 = vadd.f32 1.0, %v213_v59  ;;  %v435_v63 = vpop.eup %434  ;;  %v203_v19 = vadd.f32 1.1283791, %v202_v9 }
  0xcc   :  { %v176_v0 = vmul.f32 %v435_v63, %v174_v54  ;;  %vm181_vm0 = vweird.f32 %v435_v63 }
  0xcd   :  { %436 = vrcp.f32 %v214_v62  ;;  %vm182_vm2 = vmor %vm180_vm1, %vm181_vm0  ;;  %v226_v21 = vand.u32 2147483648, %v214_v62  ;;  %v224_v25 = vand.u32 2147483647, %v214_v62  ;;  %vm220_vm5 = vweird.f32 %v214_v62 }
  0xce   :  { %v177_v3 = vsub.f32 1.0, %v176_v0  ;;  %v204_v28 = vmul.f32 %v203_v19, %v546_v24  ;;  %v433_v24 = vld [vmem:[%s567_s4] ss:$0 sm:$0xff] }
  0xcf   :  { %v227_v27 = vor.u32 1.1754944e-38, %v226_v21  ;;  %vm225_vm7 = vcmp.eq.f32.partialorder %v224_v25, 8.507059e+37 }
  0xd0   :  { %v178_v5 = vmul.f32 %v435_v63, %v177_v3 }
  0xd2   :  { %v179_v10 = vadd.f32 %v435_v63, %v178_v5 }
  0xd3   :  { %v437_v8 = vpop.eup %436 }
  0xd4   :  { %v216_v14 = vmul.f32 %v437_v8, %v214_v62  ;;  %v183_v15 = vsel %vm182_vm2, %v435_v63, %v179_v10  ;;  %vm221_vm4 = vweird.f32 %v437_v8 }
  0xd5   :  { %v188_v18 = vsel %vm185_vm3, %v187_v11, %v183_v15  ;;  %vm222_vm6 = vmor %vm220_vm5, %vm221_vm4 }
  0xd6   :  { %v217_v17 = vsub.f32 1.0, %v216_v14  ;;  %v189_v22 = vmul.f32 %v188_v18, %v164_v16 }
  0xd8   :  { %v218_v23 = vmul.f32 %v437_v8, %v217_v17  ;;  %v376_v29 = vclamps-f32 %v189_v22, 1.0 }
  0xda   :  { %v219_v26 = vadd.f32 %v437_v8, %v218_v23  ;;  %v232_v33 = vadd.f32 1.0, %v376_v29 }
  0xdc   :  { %v223_v30 = vsel %vm222_vm6, %v437_v8, %v219_v26  ;;  %v234_v37 = vmul.f32 %v232_v33, %v148_v34 }
  0xdd   :  { %v228_v31 = vsel %vm225_vm7, %v227_v27, %v223_v30 }
  0xde   :  { %v229_v32 = vmul.f32 %v228_v31, %v204_v28 }
  0xe0   :  { %v377_v13 = vclamps-f32 %v229_v32, 1.0 }
  0xe2   :  { %v233_v36 = vadd.f32 1.0, %v377_v13 }
  0xe4   :  { %v235_v38 = vmul.f32 %v233_v36, %v149_v35 }
  0xe6   :  { %v238_v39 = vpack.c.bf16 %v235_v38, %v234_v37 }
  0xe8   :  { %311 = vmatmul.bf16.vlgmr.msra.gmra.mxu1 %v238_v39 }
 0x165   :  { %v312_v40 = vpop.f32.mrf.mxu1 }
 0x166   :  { %v330_v41 = vadd.f32 %v433_v24, %v312_v40 }
 0x168   :  { %332 = vst [vmem:[%s568_s5] sm:$0xff] %v330_v41 }
 0x16d   :  { %v314_v42 = vpop.f32.mrf.mxu1 }
 0x16e   :  { %v331_v43 = vadd.f32 %v433_v24, %v314_v42 }
 0x170   :  { %333 = vst [vmem:[%s568_s5 + $0x8] sm:$0xff] %v331_v43 }
 0x171   :  { %338 = vsyncpa [#allocation3], 1 }
 0x172   :  { %339 = vsyncpa [#allocation5], 1 }

</bundles_post_ra>
